<compile_context>
chip_gen: v5e
topology: v5e:2x2
jax: 0.10.0
libtpu: 0.0.40
codegen_flags: <defaults>
</compile_context>

<pallas_src>
import functools

import jax
import jax.numpy as jnp
from jax.experimental import pallas as pl
from jax.experimental.pallas import tpu as pltpu


def _sse_kernel(yt_ref, yp_ref, out_ref, *, batch_n, tn, needs_mask):
    i = pl.program_id(0)
    last = pl.num_programs(0) - 1

    @pl.when(i == 0)
    def _init():
        out_ref[...] = jnp.zeros_like(out_ref)

    # yt_ref / yp_ref are (TN, F) tiles covering rows [i*TN, (i+1)*TN).
    d = yt_ref[...].astype(jnp.float32) - yp_ref[...].astype(jnp.float32)
    sq = d * d

    if needs_mask:
        # Rows past the true batch size come from padded (undefined) reads of
        # the last block; zero them before reducing.
        row = jax.lax.broadcasted_iota(jnp.int32, sq.shape, 0) + i * tn
        sq = jnp.where(row < batch_n, sq, 0.0)

    # (TN, F) -> (TN, 1) lane reduce -> (1, 1) sublane reduce (kept 2-D).
    partial = jnp.sum(jnp.sum(sq, axis=1, keepdims=True), axis=0, keepdims=True)
    out_ref[...] += partial

    @pl.when(i == last)
    def _finalize():
        out_ref[...] = out_ref[...] / jnp.float32(batch_n)


def mse_custom(y_true: jax.Array, y_pred: jax.Array, *, block_bytes: int = 2 * 1024 * 1024) -> jax.Array:
    """sum((y_true - y_pred)**2) / y_true.shape[0], as a scalar."""
    assert y_true.shape == y_pred.shape
    n = y_true.shape[0]

    # Flatten trailing dims: reduction is over everything, divisor is only N.
    yt = y_true.reshape(n, -1)
    yp = y_pred.reshape(n, -1)
    f = yt.shape[1]

    # Rows per block: big enough to amortize per-step overhead, small enough
    # that 2 inputs x 2 pipeline buffers fit the smallest (v5e) scoped VMEM.
    bytes_per_row = max(f * yt.dtype.itemsize, 1)
    tn = max(1, block_bytes // bytes_per_row)
    if tn >= n:
        tn = n                       # whole batch in one block (full-dim block is always legal)
    else:
        tn = max(8, (tn // 8) * 8)   # sublane-aligned partial blocks

    grid_n = pl.cdiv(n, tn)
    needs_mask = (n % tn) != 0

    kernel = functools.partial(_sse_kernel, batch_n=n, tn=tn, needs_mask=needs_mask)

    out = pl.pallas_call(
        kernel,
        out_shape=jax.ShapeDtypeStruct((1, 1), jnp.float32),
        grid_spec=pltpu.PrefetchScalarGridSpec(
            num_scalar_prefetch=0,
            grid=(grid_n,),
            in_specs=[
                pl.BlockSpec((tn, f), lambda i: (i, 0)),
                pl.BlockSpec((tn, f), lambda i: (i, 0)),
            ],
            out_specs=pl.BlockSpec((1, 1), lambda i: (0, 0)),
        ),
        compiler_params=pltpu.CompilerParams(
            dimension_semantics=("arbitrary",),  # reduction axis; output stays resident
        ),
    )(yt, yp)

    return out[0, 0]


if __name__ == "__main__":
    key = jax.random.PRNGKey(0)
    k1, k2 = jax.random.split(key)

    N, H, W = 8, 16, 128
    y_true = jax.random.normal(k1, (N, H, W), dtype=jnp.float32)
    y_pred = jax.random.normal(k2, (N, H, W), dtype=jnp.float32)

    out = mse_custom(y_true, y_pred)
    out = jax.block_until_ready(out)

    ref = jnp.sum((y_true - y_pred) ** 2) / N
    assert out.shape == ()
    assert jnp.allclose(out, ref, atol=1e-2, rtol=1e-5), (out, ref)

    # Also exercise the multi-block + masked-tail path (N not divisible by TN).
    N2 = 13
    yt2 = jax.random.normal(k1, (N2, H, W), dtype=jnp.float32)
    yp2 = jax.random.normal(k2, (N2, H, W), dtype=jnp.float32)
    out2 = jax.block_until_ready(mse_custom(yt2, yp2, block_bytes=4096))
    ref2 = jnp.sum((yt2 - yp2) ** 2) / N2
    assert jnp.allclose(out2, ref2, atol=1e-2, rtol=1e-5), (out2, ref2)

    print("KERNEL_OK")
</pallas_src>

<mosaic_0001>
module attributes {stable_mosaic.version = 11 : i64} {
  func.func @_sse_kernel(%arg0: i32, %arg1: memref<8x2048xf32, #tpu.memory_space<vmem>>, %arg2: memref<8x2048xf32, #tpu.memory_space<vmem>>, %arg3: memref<1x1xf32, #tpu.memory_space<vmem>>) attributes {dimension_semantics = [#tpu.dimension_semantics<arbitrary>], iteration_bounds = array<i64: 1>, scalar_prefetch = 0 : i64, scratch_operands = 0 : i64, tpu.core_type = #tpu.core_type<tc>, window_params = [{transform_indices = @transform_0, window_bounds = array<i64: 8, 2048>}, {transform_indices = @transform_1, window_bounds = array<i64: 8, 2048>}, {pipeline_mode = #tpu.pipeline_mode<synchronous>, transform_indices = @transform_2, window_bounds = array<i64: 1, 1>}]} {
    %c0_i32 = arith.constant 0 : i32
    %0 = arith.cmpi eq, %arg0, %c0_i32 : i32
    %1 = arith.extui %0 : i1 to i32
    %c0_i32_0 = arith.constant 0 : i32
    %2 = arith.cmpi ne, %1, %c0_i32_0 : i32
    scf.if %2 {
      %cst_11 = arith.constant 0.000000e+00 : f32
      %17 = vector.broadcast %cst_11 : f32 to vector<1x1xf32>
      %c0_12 = arith.constant 0 : index
      %c0_13 = arith.constant 0 : index
      %18 = vector.load %arg3[%c0_12, %c0_13] : memref<1x1xf32, #tpu.memory_space<vmem>>, vector<1x1xf32>
      tpu.vector_store %arg3[%c0_12, %c0_13], %17 {strides = array<i32>} : memref<1x1xf32, #tpu.memory_space<vmem>>, vector<1x1xf32>,
    } else {
    }
    %c0 = arith.constant 0 : index
    %c0_1 = arith.constant 0 : index
    %3 = vector.load %arg1[%c0, %c0_1] : memref<8x2048xf32, #tpu.memory_space<vmem>>, vector<8x2048xf32>
    %c0_2 = arith.constant 0 : index
    %c0_3 = arith.constant 0 : index
    %4 = vector.load %arg2[%c0_2, %c0_3] : memref<8x2048xf32, #tpu.memory_space<vmem>>, vector<8x2048xf32>
    %5 = arith.subf %3, %4 : vector<8x2048xf32>
    %6 = arith.mulf %5, %5 : vector<8x2048xf32>
    %cst = arith.constant dense<0.000000e+00> : vector<8xf32>
    %7 = vector.multi_reduction <add>, %6, %cst [1] : vector<8x2048xf32> to vector<8xf32>
    %8 = vector.shape_cast %7 : vector<8xf32> to vector<8x1xf32>
    %cst_4 = arith.constant dense<0.000000e+00> : vector<1xf32>
    %9 = vector.multi_reduction <add>, %8, %cst_4 [0] : vector<8x1xf32> to vector<1xf32>
    %10 = vector.shape_cast %9 : vector<1xf32> to vector<1x1xf32>
    %c0_5 = arith.constant 0 : index
    %c0_6 = arith.constant 0 : index
    %11 = vector.load %arg3[%c0_5, %c0_6] : memref<1x1xf32, #tpu.memory_space<vmem>>, vector<1x1xf32>
    %12 = arith.addf %11, %10 : vector<1x1xf32>
    %c0_7 = arith.constant 0 : index
    %c0_8 = arith.constant 0 : index
    %13 = vector.load %arg3[%c0_7, %c0_8] : memref<1x1xf32, #tpu.memory_space<vmem>>, vector<1x1xf32>
    tpu.vector_store %arg3[%c0_7, %c0_8], %12 {strides = array<i32>} : memref<1x1xf32, #tpu.memory_space<vmem>>, vector<1x1xf32>,
    %c0_i32_9 = arith.constant 0 : i32
    %14 = arith.cmpi eq, %arg0, %c0_i32_9 : i32
    %15 = arith.extui %14 : i1 to i32
    %c0_i32_10 = arith.constant 0 : i32
    %16 = arith.cmpi ne, %15, %c0_i32_10 : i32
    scf.if %16 {
      %c0_11 = arith.constant 0 : index
      %c0_12 = arith.constant 0 : index
      %17 = vector.load %arg3[%c0_11, %c0_12] : memref<1x1xf32, #tpu.memory_space<vmem>>, vector<1x1xf32>
      %cst_13 = arith.constant 8.000000e+00 : f32
      %18 = vector.broadcast %cst_13 : f32 to vector<1x1xf32>
      %19 = arith.divf %17, %18 : vector<1x1xf32>
      %c0_14 = arith.constant 0 : index
      %c0_15 = arith.constant 0 : index
      %20 = vector.load %arg3[%c0_14, %c0_15] : memref<1x1xf32, #tpu.memory_space<vmem>>, vector<1x1xf32>
      tpu.vector_store %arg3[%c0_14, %c0_15], %19 {strides = array<i32>} : memref<1x1xf32, #tpu.memory_space<vmem>>, vector<1x1xf32>,
    } else {
    }
    return
  }
  func.func @transform_0(%arg0: i32) -> (i32, i32) {
    %c0_i32 = arith.constant 0 : i32
    %c0_i32_0 = arith.constant 0 : i32
    return %arg0, %c0_i32 : i32, i32
  }
  func.func @transform_1(%arg0: i32) -> (i32, i32) {
    %c0_i32 = arith.constant 0 : i32
    %c0_i32_0 = arith.constant 0 : i32
    return %arg0, %c0_i32 : i32, i32
  }
  func.func @transform_2(%arg0: i32) -> (i32, i32) {
    %c0_i32 = arith.constant 0 : i32
    %c0_i32_0 = arith.constant 0 : i32
    %c0_i32_1 = arith.constant 0 : i32
    return %c0_i32, %c0_i32_0 : i32, i32
  }
}

</mosaic_0001>

<bundles_post_ra>
// kernel: tpu_custom_call.1
= control target key start
LH: loop header
LB: loop body
LE: loop exit
PB: predicated region body
PF: predicated region fallthrough
CT: control target
= control target key end

     0   :  { %7 = vsyncpa [#allocation3], 0  ;;  %s285_s0 = inlined_call_operand.hbm [shape: f32[8,2048], index: 0, kind: input, shape index: {}]   ;;  %s286_s1 = inlined_call_operand.hbm [shape: f32[8,2048], index: 1, kind: input, shape index: {}]   ;;  %s287_s2 = inlined_call_operand.hbm [shape: f32[1,1], index: 2, kind: output, shape index: {}]  }
   0x1   :  { %8 = vsyncpa [#allocation6], 0 }
   0x2   :  { %9 = vsyncpa [#allocation4], 0  ;;  %s15_s11 = sshll.u32 %s285_s0, 4  ;;  %s253_s12 = smov [#allocation2]   ;;  %s16_s11 = int_to_ptr.hbm [resolvable:$true] %s15_s11 }
   0x3   :  { %s17_s13 = sshll.u32 %s253_s12, 4  ;;  %s26_s16 = sshll.u32 %s286_s1, 4  ;;  %s18_s13 = int_to_ptr.vmem [resolvable:$true] %s17_s13  ;;  %s27_s16 = int_to_ptr.hbm [resolvable:$true] %s26_s16 }
   0x4   :  { %20 = dma.hbm_to_vmem [thread:$0]  %s16_s11, 2048, %s18_s13, [#allocation3]  }
   0x5   :  { %s254_s17 = smov [#allocation5]  }
   0x6   :  { %s28_s18 = sshll.u32 %s254_s17, 4  ;;  %s29_s18 = int_to_ptr.vmem [resolvable:$true] %s28_s18 }
   0x7   :  { %31 = dma.hbm_to_vmem [thread:$0]  %s27_s16, 2048, %s29_s18, [#allocation6]  }
   0x8   :  { %247 = dma.done.wait [#allocation3], 2048  }
   0x9   :  { %248 = vsyncadd [#allocation3], 4294965248 }
   0xa   :  { %249 = dma.done.wait [#allocation6], 2048  }
   0xb   :  { %250 = vsyncadd [#allocation6], 4294965248  ;;  %v46_v0 = vld [vmem:[#allocation2] sm:$0xff]  ;;  %v47_v1 = vld [vmem:[#allocation2 + $0x8] sm:$0xff]  ;;  %vm44_vm0 = vcmask 0   ;;  %v255_v30 = vmov 0.0  }
   0xc   :  { %v48_v2 = vld [vmem:[#allocation2 + $0x10] sm:$0xff]  ;;  %v62_v3 = vld [vmem:[#allocation5] sm:$0xff]  ;;  %v63_v4 = vld [vmem:[#allocation5 + $0x8] sm:$0xff]  ;;  %45 = vst.msk [vmem:[#allocation7] sm:$0x1] %vm44_vm0, %v255_v30  ;;  %s257_s0 = smov [#allocation7]  }
   0xd   :  { %v64_v5 = vld [vmem:[#allocation5 + $0x10] sm:$0xff]  ;;  %v78_v6 = vsub.f32 %v46_v0, %v62_v3  ;;  %v79_v7 = vsub.f32 %v47_v1, %v63_v4  ;;  %v49_v8 = vld [vmem:[#allocation2 + $0x18] sm:$0xff]  ;;  %v50_v11 = vld [vmem:[#allocation2 + $0x20] sm:$0xff]  ;;  %s155_s1 = sshll.u32 %s257_s0, 4  ;;  %s157_s21 = sshll.u32 %s287_s2, 4  ;;  %s156_s1 = int_to_ptr.vmem [resolvable:$true] %s155_s1  ;;  %s158_s21 = int_to_ptr.hbm [resolvable:$true] %s157_s21 }
   0xe   :  { %v65_v9 = vld [vmem:[#allocation5 + $0x18] sm:$0xff]  ;;  %v80_v10 = vsub.f32 %v48_v2, %v64_v5  ;;  %v66_v12 = vld [vmem:[#allocation5 + $0x20] sm:$0xff]  ;;  %v51_v16 = vld [vmem:[#allocation2 + $0x28] sm:$0xff] }
   0xf   :  { %v81_v13 = vsub.f32 %v49_v8, %v65_v9  ;;  %v94_v14 = vmul.f32 %v78_v6, %v78_v6  ;;  %v95_v15 = vmul.f32 %v79_v7, %v79_v7  ;;  %v67_v17 = vld [vmem:[#allocation5 + $0x28] sm:$0xff]  ;;  %v82_v18 = vsub.f32 %v50_v11, %v66_v12  ;;  %v52_v20 = vld [vmem:[#allocation2 + $0x30] sm:$0xff]  ;;  %v53_v25 = vld [vmem:[#allocation2 + $0x38] sm:$0xff] }
  0x10   :  { %v96_v19 = vmul.f32 %v80_v10, %v80_v10  ;;  %v68_v21 = vld [vmem:[#allocation5 + $0x30] sm:$0xff]  ;;  %v83_v22 = vsub.f32 %v51_v16, %v67_v17  ;;  %v69_v26 = vld [vmem:[#allocation5 + $0x38] sm:$0xff]  ;;  %v54_v31 = vld [vmem:[#allocation2 + $0x40] sm:$0xff]  ;;  %v256_v16 = vmov 8.0  }
  0x11   :  { %v97_v23 = vmul.f32 %v81_v13, %v81_v13  ;;  %v110_v24 = vadd.f32 %v95_v15, %v94_v14  ;;  %v84_v27 = vsub.f32 %v52_v20, %v68_v21  ;;  %v98_v28 = vmul.f32 %v82_v18, %v82_v18  ;;  %v70_v32 = vld [vmem:[#allocation5 + $0x40] sm:$0xff]  ;;  %v55_v36 = vld [vmem:[#allocation2 + $0x48] sm:$0xff]  ;;  %v56_v41 = vld [vmem:[#allocation2 + $0x50] sm:$0xff] }
  0x12   :  { %v85_v33 = vsub.f32 %v53_v25, %v69_v26  ;;  %v99_v34 = vmul.f32 %v83_v22, %v83_v22  ;;  %v71_v37 = vld [vmem:[#allocation5 + $0x48] sm:$0xff]  ;;  %v86_v38 = vsub.f32 %v54_v31, %v70_v32  ;;  %v72_v42 = vld [vmem:[#allocation5 + $0x50] sm:$0xff]  ;;  %v57_v46 = vld [vmem:[#allocation2 + $0x58] sm:$0xff]  ;;  %173 = vrcp.f32 %v256_v16 }
  0x13   :  { %v111_v29 = vadd.f32 %v110_v24, %v96_v19  ;;  %v100_v39 = vmul.f32 %v84_v27, %v84_v27  ;;  %v87_v43 = vsub.f32 %v55_v36, %v71_v37  ;;  %v73_v47 = vld [vmem:[#allocation5 + $0x58] sm:$0xff]  ;;  %v88_v48 = vsub.f32 %v56_v41, %v72_v42  ;;  %v58_v51 = vld [vmem:[#allocation2 + $0x60] sm:$0xff]  ;;  %v59_v56 = vld [vmem:[#allocation2 + $0x68] sm:$0xff] }
  0x14   :  { %v101_v44 = vmul.f32 %v85_v33, %v85_v33  ;;  %v102_v49 = vmul.f32 %v86_v38, %v86_v38  ;;  %v74_v52 = vld [vmem:[#allocation5 + $0x60] sm:$0xff]  ;;  %v89_v53 = vsub.f32 %v57_v46, %v73_v47  ;;  %v75_v57 = vld [vmem:[#allocation5 + $0x68] sm:$0xff]  ;;  %v60_v61 = vld [vmem:[#allocation2 + $0x70] sm:$0xff] }
  0x15   :  { %v112_v35 = vadd.f32 %v111_v29, %v97_v23  ;;  %v103_v54 = vmul.f32 %v87_v43, %v87_v43  ;;  %v90_v58 = vsub.f32 %v58_v51, %v74_v52  ;;  %v104_v59 = vmul.f32 %v88_v48, %v88_v48  ;;  %v76_v62 = vld [vmem:[#allocation5 + $0x70] sm:$0xff]  ;;  %v61_v2 = vld [vmem:[#allocation2 + $0x78] sm:$0xff]  ;;  %v133_v26 = vld [vmem:[#allocation7] sm:$0x1] }
  0x16   :  { %v91_v63 = vsub.f32 %v59_v56, %v75_v57  ;;  %v105_v0 = vmul.f32 %v89_v53, %v89_v53  ;;  %v77_v3 = vld [vmem:[#allocation5 + $0x78] sm:$0xff]  ;;  %v92_v4 = vsub.f32 %v60_v61, %v76_v62 }
  0x17   :  { %v113_v40 = vadd.f32 %v112_v35, %v98_v28  ;;  %v106_v5 = vmul.f32 %v90_v58, %v90_v58  ;;  %v93_v7 = vsub.f32 %v61_v2, %v77_v3 }
  0x18   :  { %v107_v8 = vmul.f32 %v91_v63, %v91_v63  ;;  %v108_v10 = vmul.f32 %v92_v4, %v92_v4  ;;  %v174_v18 = vpop.eup %173 }
  0x19   :  { %v114_v45 = vadd.f32 %v113_v40, %v99_v34  ;;  %v109_v12 = vmul.f32 %v93_v7, %v93_v7  ;;  %v142_v21 = vmul.f32 8.0, %v174_v18  ;;  %vm146_vm1 = vweird.f32 %v174_v18 }
  0x1b   :  { %v115_v50 = vadd.f32 %v114_v45, %v100_v39  ;;  %v143_v24 = vsub.f32 1.0, %v142_v21 }
  0x1d   :  { %v116_v55 = vadd.f32 %v115_v50, %v101_v44  ;;  %v144_v28 = vmul.f32 %v174_v18, %v143_v24 }
  0x1f   :  { %v117_v60 = vadd.f32 %v116_v55, %v102_v49  ;;  %v145_v30 = vadd.f32 %v174_v18, %v144_v28 }
  0x21   :  { %v118_v1 = vadd.f32 %v117_v60, %v103_v54  ;;  %v147_v31 = vsel %vm146_vm1, %v174_v18, %v145_v30 }
  0x23   :  { %v119_v6 = vadd.f32 %v118_v1, %v104_v59 }
  0x25   :  { %v120_v9 = vadd.f32 %v119_v6, %v105_v0 }
  0x27   :  { %v121_v11 = vadd.f32 %v120_v9, %v106_v5 }
  0x29   :  { %v122_v13 = vadd.f32 %v121_v11, %v107_v8 }
  0x2b   :  { %v123_v14 = vadd.f32 %v122_v13, %v108_v10 }
  0x2d   :  { %v124_v15 = vadd.f32 %v123_v14, %v109_v12 }
  0x2f   :  { %125 = vadd.xlane.f32.xlu0 %v124_v15 }
  0xa2   :  { %v126_v17 = vpop.xlane.xlu0 %125 }
  0xa3   :  { %v127_v19 = vrot.slane %v126_v17, 4 }
  0xa5   :  { %v128_v20 = vadd.f32 %v127_v19, %v126_v17 }
  0xa7   :  { %v129_v22 = vrot.slane %v128_v20, 2 }
  0xa9   :  { %v130_v23 = vadd.f32 %v129_v22, %v128_v20 }
  0xab   :  { %v131_v25 = vrot.slane %v130_v23, 1 }
  0xad   :  { %v132_v27 = vadd.f32 %v131_v25, %v130_v23 }
  0xaf   :  { %v134_v29 = vadd.f32 %v133_v26, %v132_v27 }
  0xb1   :  { %136 = vst.msk [vmem:[#allocation7] sm:$0x1] %vm44_vm0, %v134_v29 }
  0xb8   :  { %v140_v32 = vld [vmem:[#allocation7] sm:$0x1] }
  0xb9   :  { %v148_v33 = vmul.f32 %v147_v31, %v140_v32 }
  0xbb   :  { %149 = vst.msk [vmem:[#allocation7] sm:$0x1] %vm44_vm0, %v148_v33 }
  0xbc   :  { %160 = dma.vmem_to_hbm [thread:$0]  %s156_s1, 16, %s158_s21, [#allocation4]  }
  0xbd   :  { %251 = dma.done.wait [#allocation4], 16  }
  0xbe   :  { %252 = vsyncadd [#allocation4], 4294967280 }
  0xbf   :  { %165 = vsyncpa [#allocation3], 1 }
  0xc0   :  { %166 = vsyncpa [#allocation6], 1 }
  0xc1   :  { %167 = vsyncpa [#allocation4], 1 }

</bundles_post_ra>
